<compile_context>
chip_gen: v6e
topology: v6e:2x2x1
jax: 0.10.0
libtpu: 0.0.40
codegen_flags: <defaults>
</compile_context>

<pallas_src>
import jax
import jax.numpy as jnp
from jax.experimental import pallas as pl
from jax.experimental.pallas import tpu as pltpu


def _copy_kernel(x_ref, o_ref):
    # Lane-dense block copy: (TR, L) in -> (TR, L) out.
    o_ref[...] = x_ref[...]


def _sublane_align(itemsize):
    # fp32 -> 8, bf16 -> 16, int8/fp8 -> 32 (sub-32-bit dtypes pack sublanes).
    return 8 * max(1, 4 // itemsize)


def _choose_slab(N, F, sub_align):
    """Pick a 2D view (R, L) of the N*F contiguous elements for the copy.

    Preference order:
      * F already a multiple of 128 -> keep (N, F): fully lane-dense as is.
      * Otherwise, if N*F is a multiple of 128, repack into (R, 128*k) with
        the smallest padded-vreg footprint (rows rounded up to sub_align),
        tie-broken toward wider lanes (larger unmasked vst).
      * Otherwise keep (N, F) and rely on full-extent last-dim blocks.
    """
    if F % 128 == 0:
        return N, F
    total = N * F
    if total % 128 != 0:
        return N, F
    units = total // 128
    best_k = 1
    best_key = None
    for k in range(1, min(units, 32) + 1):
        if units % k:
            continue
        rows = units // k
        padded_rows = -(-rows // sub_align) * sub_align
        footprint = padded_rows * 128 * k          # padded vreg footprint
        key = (-footprint, k)                      # min footprint, then max lanes
        if best_key is None or key > best_key:
            best_key, best_k = key, k
    return units // best_k, 128 * best_k


def _choose_row_tile(R, L, itemsize, sub_align):
    """Row-tile size TR: multiple of sub_align (or == R), VMEM-budgeted,
    and at least 2 grid steps when the slab is tall enough (v7x megacore)."""
    l_pad = -(-L // 128) * 128
    per_row_bytes = 4 * l_pad * itemsize           # 2 in bufs + 2 out bufs
    budget = 12 * 1024 * 1024
    tr = max(sub_align, budget // per_row_bytes)
    tr = (tr // sub_align) * sub_align
    tr = min(tr, 1024)
    if R >= 2 * sub_align:
        half = -(-R // 2)
        half = -(-half // sub_align) * sub_align   # round up to alignment
        tr = min(tr, half)
    if R <= tr:
        return R                                   # single block: full extent is legal
    return tr


def unflatten(x, C=3, H=8, W=8):
    """x: (N, C*H*W) -> (N, C, H, W); semantics of torch .view(N, C, H, W)."""
    N, F = x.shape
    assert F == C * H * W, f"expected last dim {C * H * W}, got {F}"

    itemsize = jnp.dtype(x.dtype).itemsize
    sub_align = _sublane_align(itemsize)

    R, L = _choose_slab(N, F, sub_align)
    slab = x.reshape(R, L)                         # contiguous view: metadata only

    TR = _choose_row_tile(R, L, itemsize, sub_align)
    grid = (pl.cdiv(R, TR),)

    out = pl.pallas_call(
        _copy_kernel,
        out_shape=jax.ShapeDtypeStruct((R, L), x.dtype),
        grid=grid,
        in_specs=[pl.BlockSpec((TR, L), lambda i: (i, 0))],
        out_specs=pl.BlockSpec((TR, L), lambda i: (i, 0)),
        compiler_params=pltpu.CompilerParams(
            dimension_semantics=("parallel",),
        ),
    )(slab)

    # NCHW reshape outside the kernel: pure metadata / cheap XLA layout op.
    return out.reshape(N, C, H, W)


if __name__ == "__main__":
    key = jax.random.PRNGKey(0)

    # 1) Module defaults: C=3, H=8, W=8 -> flattened feature dim = 192.
    N, C, H, W = 2, 3, 8, 8
    x = jax.random.normal(key, (N, C * H * W), dtype=jnp.float32)
    y = jax.block_until_ready(unflatten(x, C=C, H=H, W=W))
    ref = x.reshape(N, C, H, W)
    assert y.shape == (N, C, H, W)
    assert y.dtype == x.dtype
    assert jnp.array_equal(y, ref)

    # 2) Taller batch exercising the lane-dense repack + multi-step row tiling.
    N2, C2, H2, W2 = 512, 3, 8, 8
    x2 = jax.random.normal(jax.random.PRNGKey(1), (N2, C2 * H2 * W2),
                           dtype=jnp.float32)
    y2 = jax.block_until_ready(unflatten(x2, C=C2, H=H2, W=W2))
    assert jnp.array_equal(y2, x2.reshape(N2, C2, H2, W2))

    # 3) Feature dim already a multiple of 128 -> direct (N, F) copy path.
    N3, C3, H3, W3 = 16, 2, 8, 8
    x3 = jax.random.normal(jax.random.PRNGKey(2), (N3, C3 * H3 * W3),
                           dtype=jnp.float32)
    y3 = jax.block_until_ready(unflatten(x3, C=C3, H=H3, W=W3))
    assert jnp.array_equal(y3, x3.reshape(N3, C3, H3, W3))

    print("KERNEL_OK")
</pallas_src>

<mosaic_0001>
module attributes {stable_mosaic.version = 11 : i64} {
  func.func @_copy_kernel(%arg0: i32, %arg1: memref<3x128xf32, #tpu.memory_space<vmem>>, %arg2: memref<3x128xf32, #tpu.memory_space<vmem>>) attributes {dimension_semantics = [#tpu.dimension_semantics<parallel>], iteration_bounds = array<i64: 1>, scalar_prefetch = 0 : i64, scratch_operands = 0 : i64, tpu.core_type = #tpu.core_type<tc>, window_params = [{transform_indices = @transform_0, window_bounds = array<i64: 3, 128>}, {transform_indices = @transform_1, window_bounds = array<i64: 3, 128>}]} {
    %c0 = arith.constant 0 : index
    %c0_0 = arith.constant 0 : index
    %0 = vector.load %arg1[%c0, %c0_0] : memref<3x128xf32, #tpu.memory_space<vmem>>, vector<3x128xf32>
    %c0_1 = arith.constant 0 : index
    %c0_2 = arith.constant 0 : index
    %1 = vector.load %arg2[%c0_1, %c0_2] : memref<3x128xf32, #tpu.memory_space<vmem>>, vector<3x128xf32>
    tpu.vector_store %arg2[%c0_1, %c0_2], %0 {strides = array<i32>} : memref<3x128xf32, #tpu.memory_space<vmem>>, vector<3x128xf32>,
    return
  }
  func.func @transform_0(%arg0: i32) -> (i32, i32) {
    %c0_i32 = arith.constant 0 : i32
    %c0_i32_0 = arith.constant 0 : i32
    return %arg0, %c0_i32 : i32, i32
  }
  func.func @transform_1(%arg0: i32) -> (i32, i32) {
    %c0_i32 = arith.constant 0 : i32
    %c0_i32_0 = arith.constant 0 : i32
    return %arg0, %c0_i32 : i32, i32
  }
}

</mosaic_0001>

<bundles_post_ra>
// kernel: tpu_custom_call.1
= control target key start
LH: loop header
LB: loop body
LE: loop exit
PB: predicated region body
PF: predicated region fallthrough
CT: control target
= control target key end

     0   :  { %6 = vsyncpa [#allocation3], 0  ;;  %s102_s0 = inlined_call_operand.hbm [shape: f32[3,128], index: 0, kind: input, shape index: {}]   ;;  %s103_s1 = inlined_call_operand.hbm [shape: f32[3,128], index: 1, kind: output, shape index: {}]  }
   0x1   :  { %7 = vsyncpa [#allocation4], 0  ;;  %s84_s6 = smov [#allocation2]  }
   0x2   :  { %s14_s7 = sshll.u32 %s84_s6, 4  ;;  %s15_s7 = int_to_ptr.vmem [resolvable:$true] %s14_s7 }
   0x3   :  { %s48_s8 = scalar_lea.vmem %s15_s7, 64  ;;  %p53_p1 = scmp.lt.s32.totalorder %s15_s7, %s15_s7 }
   0x4   :  { %p49_p0 = scmp.ne.s32.totalorder %s15_s7, %s48_s8  ;;  %p54_p2 = scmp.lt.s32.totalorder %s48_s8, %s48_s8 }
   0x6   :  { %p55_p3 = por %p54_p2, %p53_p1 }
   0x8   :  { %p56_p4 = pnand %p55_p3, %p49_p0 }
   0xa   :  { %59 = shalt.err (!%p56_p4)
}
   0xb   :  { %17 = dma.hbm_to_vmem [thread:$0]  %s102_s0, 64, %s15_s7, [#allocation3]  }
   0xc   :  { %80 = dma.done.wait [#allocation3], 64  }
   0xd   :  { %81 = vsyncadd [#allocation3], 4294967232  ;;  %s85_s11 = smov [#allocation5]   ;;  %v21_v0 = vld [vmem:[#allocation2] sm:$0x7] }
   0xe   :  { %s29_s12 = sshll.u32 %s85_s11, 4  ;;  %22 = vst [vmem:[#allocation5] sm:$0x7] %v21_v0  ;;  %s30_s12 = int_to_ptr.vmem [resolvable:$true] %s29_s12 }
   0xf   :  { %s60_s13 = scalar_lea.vmem %s30_s12, 64  ;;  %p65_p6 = scmp.lt.s32.totalorder %s30_s12, %s30_s12 }
  0x10   :  { %p61_p5 = scmp.ne.s32.totalorder %s30_s12, %s60_s13  ;;  %p66_p7 = scmp.lt.s32.totalorder %s60_s13, %s60_s13 }
  0x12   :  { %p67_p8 = por %p66_p7, %p65_p6 }
  0x14   :  { %p68_p9 = pnand %p67_p8, %p61_p5 }
  0x16   :  { %71 = shalt.err (!%p68_p9)
}
  0x17   :  { %32 = dma.vmem_to_hbm [thread:$0]  %s30_s12, 64, %s103_s1, [#allocation4]  }
  0x18   :  { %82 = dma.done.wait [#allocation4], 64  }
  0x19   :  { %83 = vsyncadd [#allocation4], 4294967232 }
  0x1a   :  { %36 = vsyncpa [#allocation3], 1 }
  0x1b   :  { %37 = vsyncpa [#allocation4], 1 }

</bundles_post_ra>
